<compile_context>
chip_gen: v6e
topology: v6e:2x2x1
jax: 0.10.0
libtpu: 0.0.40
codegen_flags: <defaults>
</compile_context>

<pallas_src>
import functools

import jax
import jax.numpy as jnp
from jax.experimental import pallas as pl
from jax.experimental.pallas import tpu as pltpu


C_PAD = 128  # lane-dense padded class dimension for the head output


# ----------------------------------------------------------------------------
# Fused kernel: 2-layer HGNN over all adjacency matrices + mean + MLP head
# (Linear + LogSoftmax).  Gridless: runs exactly once, everything resident.
# ----------------------------------------------------------------------------
def hfniii_fused_kernel(x_ref, w1_ref, w2_ref, wm_ref, a_ref, b_ref, out_ref,
                        *, num_a, n, h1, h2):
    # Packed biases: row 0 = b1 (first h1 lanes), row 1 = b2 (first h2 lanes),
    # row 2 = bm padded to C_PAD with -1e30 (padded logits vanish in softmax).
    b_all = b_ref[...]                       # (3, C_PAD)
    b1 = b_all[0:1, :h1]                     # (1, H1)
    b2 = b_all[1:2, :h2]                     # (1, H2)
    bm = b_all[2:3, :]                       # (1, C_PAD)

    # z1 = x @ W1 + b1  (shared across all adjacency matrices)         (N, H1)
    z1 = jnp.dot(x_ref[...], w1_ref[...],
                 preferred_element_type=jnp.float32) + b1

    # h_i = relu(A_i @ z1) for all i, as ONE stacked matmul      (num_a*N, H1)
    a_stack = a_ref[...]                     # (num_a*N, N)
    h = jnp.maximum(
        jnp.dot(a_stack, z1, preferred_element_type=jnp.float32), 0.0)
    # TODO(synk): F.dropout(h, p) with p>0 is stochastic; dropout=0.0 -> identity.

    # z2_i = h_i @ W2 + b2 for all i                             (num_a*N, H2)
    z2 = jnp.dot(h, w2_ref[...], preferred_element_type=jnp.float32) + b2

    # s = sum_i A_i @ z2_i  (the 1/num_a mean is folded into Wm)        (N, H2)
    s = jnp.dot(a_stack[0:n, :], z2[0:n, :],
                preferred_element_type=jnp.float32)
    for i in range(1, num_a):                # static unroll, num_a is tiny
        s = s + jnp.dot(a_stack[i * n:(i + 1) * n, :],
                        z2[i * n:(i + 1) * n, :],
                        preferred_element_type=jnp.float32)

    # MLP head: logits = s @ (Wm/num_a, padded) + bm_pad ; log_softmax(dim=1).
    logits = jnp.dot(s, wm_ref[...], preferred_element_type=jnp.float32) + bm
    m = jnp.max(logits, axis=1, keepdims=True)
    shifted = logits - m
    lse = jnp.log(jnp.sum(jnp.exp(shifted), axis=1, keepdims=True))
    out_ref[...] = shifted - lse


# ----------------------------------------------------------------------------
# One-time prep (hoisted out of the per-call hot path)
# ----------------------------------------------------------------------------
def hfniii_prepare(params, adj, index):
    """Layout/param prep done once; returns materialized device arrays."""
    i0, i1 = index
    adj_slice = adj[i0:i1]                   # static slice of adjacency stack
    num_a = int(adj_slice.shape[0])
    if num_a == 0:
        raise ValueError("index must select at least one adjacency matrix")
    N = adj_slice.shape[1]
    H1 = params["w1"].shape[1]
    H2 = params["w2"].shape[1]
    C = params["wm"].shape[1]
    assert C <= C_PAD and H1 <= C_PAD and H2 <= C_PAD

    # Stack A_i vertically once: relu(A_i @ z1) for all i becomes ONE matmul.
    a_stack = adj_slice.reshape(num_a * N, N)

    # Fold the 1/num_a mean into the head weight; pad to lane-dense 128 cols.
    wm_pad = jnp.pad(params["wm"] * (1.0 / num_a), ((0, 0), (0, C_PAD - C)))

    # Pack the three biases into a single (3, C_PAD) operand. Head-bias pad
    # lanes carry -1e30 so padded logits contribute exp(.) == 0 to the softmax.
    b1_row = jnp.pad(params["b1"], ((0, 0), (0, C_PAD - H1)))
    b2_row = jnp.pad(params["b2"], ((0, 0), (0, C_PAD - H2)))
    bm_row = jnp.pad(params["bm"], ((0, 0), (0, C_PAD - C)),
                     mode="constant", constant_values=-1e30)
    b_all = jnp.concatenate([b1_row, b2_row, bm_row], axis=0)

    prep = {
        "w1": params["w1"], "w2": params["w2"], "wm": wm_pad,
        "a": a_stack, "b": b_all,
        "num_a": num_a, "nclass": C,
    }
    for k in ("w1", "w2", "wm", "a", "b"):
        prep[k] = jax.block_until_ready(jnp.asarray(prep[k], jnp.float32))
    return prep


# ----------------------------------------------------------------------------
# Per-call forward: one pallas_call + a column slice
# ----------------------------------------------------------------------------
def hfniii_forward(x, prep):
    N, _ = x.shape
    num_a = prep["num_a"]
    H1 = prep["w1"].shape[1]
    H2 = prep["w2"].shape[1]
    C = prep["nclass"]

    out_pad = pl.pallas_call(
        functools.partial(hfniii_fused_kernel,
                          num_a=num_a, n=N, h1=H1, h2=H2),
        out_shape=jax.ShapeDtypeStruct((N, C_PAD), jnp.float32),
        # Gridless: single invocation, every operand is a full resident VMEM
        # block (no pipeline / double-buffering machinery for a grid of 1).
        in_specs=[pl.BlockSpec(memory_space=pltpu.MemorySpace.VMEM)] * 6,
        out_specs=pl.BlockSpec(memory_space=pltpu.MemorySpace.VMEM),
    )(x, prep["w1"], prep["w2"], prep["wm"], prep["a"], prep["b"])

    return out_pad[:, :C]                    # glue: drop lane-padding columns


# ----------------------------------------------------------------------------
# Pure-JAX reference (for correctness check)
# ----------------------------------------------------------------------------
def hfniii_ref(x, adj, index, params):
    i0, i1 = index
    embs = []
    for k in range(i0, i1):
        A = adj[k]
        z1 = x @ params["w1"] + params["b1"]
        h = jnp.maximum(A @ z1, 0.0)
        z2 = h @ params["w2"] + params["b2"]
        embs.append(A @ z2)
    emb = sum(embs) / len(embs)
    logits = emb @ params["wm"] + params["bm"]
    return jax.nn.log_softmax(logits, axis=1)


if __name__ == "__main__":
    # Small shapes consistent with the module.
    N = 16        # number of nodes
    NFEAT = 32    # nfeat
    NHID1 = 32    # args.hid1
    NHID2 = 32    # args.hid2
    NCLASS = 8    # nclass
    M = 3         # number of adjacency (hypergraph propagation) matrices
    index = (0, 2)  # adj[index[0]:index[1]]
    # args.dropout = 0.0 (identity), args.mlp = True

    key = jax.random.PRNGKey(0)
    k_x, k_a, k_w1, k_b1, k_w2, k_b2, k_wm, k_bm = jax.random.split(key, 8)

    x = jax.random.normal(k_x, (N, NFEAT), dtype=jnp.float32)
    adj = jax.random.normal(k_a, (M, N, N), dtype=jnp.float32) * 0.1

    params = {
        "w1": jax.random.normal(k_w1, (NFEAT, NHID1), dtype=jnp.float32) * 0.1,
        "b1": jax.random.normal(k_b1, (1, NHID1), dtype=jnp.float32) * 0.1,
        "w2": jax.random.normal(k_w2, (NHID1, NHID2), dtype=jnp.float32) * 0.1,
        "b2": jax.random.normal(k_b2, (1, NHID2), dtype=jnp.float32) * 0.1,
        "wm": jax.random.normal(k_wm, (NHID2, NCLASS), dtype=jnp.float32) * 0.1,
        "bm": jax.random.normal(k_bm, (1, NCLASS), dtype=jnp.float32) * 0.1,
    }

    prep = hfniii_prepare(params, adj, index)   # one-time layout/param prep
    out = hfniii_forward(x, prep)
    out = jax.block_until_ready(out)

    ref = hfniii_ref(x, adj, index, params)
    assert out.shape == (N, NCLASS)
    assert jnp.allclose(out, ref, atol=1e-4, rtol=1e-4), "mismatch vs reference"

    print("KERNEL_OK")
</pallas_src>

<mosaic_0001>
module attributes {stable_mosaic.version = 11 : i64} {
  func.func @hfniii_fused_kernel(%arg0: memref<16x32xf32, #tpu.memory_space<vmem>>, %arg1: memref<32x32xf32, #tpu.memory_space<vmem>>, %arg2: memref<32x32xf32, #tpu.memory_space<vmem>>, %arg3: memref<32x128xf32, #tpu.memory_space<vmem>>, %arg4: memref<32x16xf32, #tpu.memory_space<vmem>>, %arg5: memref<3x128xf32, #tpu.memory_space<vmem>>, %arg6: memref<16x128xf32, #tpu.memory_space<vmem>>) attributes {dimension_semantics = [], scalar_prefetch = 0 : i64, scratch_operands = 0 : i64, tpu.core_type = #tpu.core_type<tc>} {
    %c0 = arith.constant 0 : index
    %c0_0 = arith.constant 0 : index
    %0 = vector.load %arg5[%c0, %c0_0] : memref<3x128xf32, #tpu.memory_space<vmem>>, vector<3x128xf32>
    %1 = vector.extract_strided_slice %0 {offsets = [0, 0], sizes = [1, 32], strides = [1, 1]} : vector<3x128xf32> to vector<1x32xf32>
    %2 = vector.extract_strided_slice %0 {offsets = [1, 0], sizes = [1, 32], strides = [1, 1]} : vector<3x128xf32> to vector<1x32xf32>
    %3 = vector.extract_strided_slice %0 {offsets = [2, 0], sizes = [1, 128], strides = [1, 1]} : vector<3x128xf32> to vector<1x128xf32>
    %c0_1 = arith.constant 0 : index
    %c0_2 = arith.constant 0 : index
    %4 = vector.load %arg0[%c0_1, %c0_2] : memref<16x32xf32, #tpu.memory_space<vmem>>, vector<16x32xf32>
    %c0_3 = arith.constant 0 : index
    %c0_4 = arith.constant 0 : index
    %5 = vector.load %arg1[%c0_3, %c0_4] : memref<32x32xf32, #tpu.memory_space<vmem>>, vector<32x32xf32>
    %cst = arith.constant dense<0.000000e+00> : vector<16x32xf32>
    %6 = tpu.matmul %4, %5, %cst {dimension_numbers = #tpu.dot_dimension_numbers<[1], [0], [0], [1], [0, 0, 1, 1], [], []>} : vector<16x32xf32>, vector<32x32xf32>, vector<16x32xf32> -> vector<16x32xf32>
    %7 = vector.broadcast %1 : vector<1x32xf32> to vector<16x32xf32>
    %8 = arith.addf %6, %7 : vector<16x32xf32>
    %c0_5 = arith.constant 0 : index
    %c0_6 = arith.constant 0 : index
    %9 = vector.load %arg4[%c0_5, %c0_6] : memref<32x16xf32, #tpu.memory_space<vmem>>, vector<32x16xf32>
    %cst_7 = arith.constant dense<0.000000e+00> : vector<32x32xf32>
    %10 = tpu.matmul %9, %8, %cst_7 {dimension_numbers = #tpu.dot_dimension_numbers<[1], [0], [0], [1], [0, 0, 1, 1], [], []>} : vector<32x16xf32>, vector<16x32xf32>, vector<32x32xf32> -> vector<32x32xf32>
    %cst_8 = arith.constant 0.000000e+00 : f32
    %11 = vector.broadcast %cst_8 : f32 to vector<32x32xf32>
    %12 = arith.maximumf %10, %11 : vector<32x32xf32>
    %c0_9 = arith.constant 0 : index
    %c0_10 = arith.constant 0 : index
    %13 = vector.load %arg2[%c0_9, %c0_10] : memref<32x32xf32, #tpu.memory_space<vmem>>, vector<32x32xf32>
    %cst_11 = arith.constant dense<0.000000e+00> : vector<32x32xf32>
    %14 = tpu.matmul %12, %13, %cst_11 {dimension_numbers = #tpu.dot_dimension_numbers<[1], [0], [0], [1], [0, 0, 1, 1], [], []>} : vector<32x32xf32>, vector<32x32xf32>, vector<32x32xf32> -> vector<32x32xf32>
    %15 = vector.broadcast %2 : vector<1x32xf32> to vector<32x32xf32>
    %16 = arith.addf %14, %15 : vector<32x32xf32>
    %17 = vector.extract_strided_slice %9 {offsets = [0, 0], sizes = [16, 16], strides = [1, 1]} : vector<32x16xf32> to vector<16x16xf32>
    %18 = vector.extract_strided_slice %16 {offsets = [0, 0], sizes = [16, 32], strides = [1, 1]} : vector<32x32xf32> to vector<16x32xf32>
    %cst_12 = arith.constant dense<0.000000e+00> : vector<16x32xf32>
    %19 = tpu.matmul %17, %18, %cst_12 {dimension_numbers = #tpu.dot_dimension_numbers<[1], [0], [0], [1], [0, 0, 1, 1], [], []>} : vector<16x16xf32>, vector<16x32xf32>, vector<16x32xf32> -> vector<16x32xf32>
    %20 = vector.extract_strided_slice %9 {offsets = [16, 0], sizes = [16, 16], strides = [1, 1]} : vector<32x16xf32> to vector<16x16xf32>
    %21 = vector.extract_strided_slice %16 {offsets = [16, 0], sizes = [16, 32], strides = [1, 1]} : vector<32x32xf32> to vector<16x32xf32>
    %cst_13 = arith.constant dense<0.000000e+00> : vector<16x32xf32>
    %22 = tpu.matmul %20, %21, %cst_13 {dimension_numbers = #tpu.dot_dimension_numbers<[1], [0], [0], [1], [0, 0, 1, 1], [], []>} : vector<16x16xf32>, vector<16x32xf32>, vector<16x32xf32> -> vector<16x32xf32>
    %23 = arith.addf %19, %22 : vector<16x32xf32>
    %c0_14 = arith.constant 0 : index
    %c0_15 = arith.constant 0 : index
    %24 = vector.load %arg3[%c0_14, %c0_15] : memref<32x128xf32, #tpu.memory_space<vmem>>, vector<32x128xf32>
    %cst_16 = arith.constant dense<0.000000e+00> : vector<16x128xf32>
    %25 = tpu.matmul %23, %24, %cst_16 {dimension_numbers = #tpu.dot_dimension_numbers<[1], [0], [0], [1], [0, 0, 1, 1], [], []>} : vector<16x32xf32>, vector<32x128xf32>, vector<16x128xf32> -> vector<16x128xf32>
    %26 = vector.broadcast %3 : vector<1x128xf32> to vector<16x128xf32>
    %27 = arith.addf %25, %26 : vector<16x128xf32>
    %cst_17 = arith.constant dense<0xFF800000> : vector<16xf32>
    %28 = vector.multi_reduction <maximumf>, %27, %cst_17 [1] : vector<16x128xf32> to vector<16xf32>
    %29 = vector.shape_cast %28 : vector<16xf32> to vector<16x1xf32>
    %30 = vector.broadcast %29 : vector<16x1xf32> to vector<16x128xf32>
    %31 = arith.subf %27, %30 : vector<16x128xf32>
    %32 = math.exp %31 : vector<16x128xf32>
    %cst_18 = arith.constant dense<0.000000e+00> : vector<16xf32>
    %33 = vector.multi_reduction <add>, %32, %cst_18 [1] : vector<16x128xf32> to vector<16xf32>
    %34 = vector.shape_cast %33 : vector<16xf32> to vector<16x1xf32>
    %35 = math.log %34 : vector<16x1xf32>
    %36 = vector.broadcast %35 : vector<16x1xf32> to vector<16x128xf32>
    %37 = arith.subf %31, %36 : vector<16x128xf32>
    %c0_19 = arith.constant 0 : index
    %c0_20 = arith.constant 0 : index
    %38 = vector.load %arg6[%c0_19, %c0_20] : memref<16x128xf32, #tpu.memory_space<vmem>>, vector<16x128xf32>
    tpu.vector_store %arg6[%c0_19, %c0_20], %37 {strides = array<i32>} : memref<16x128xf32, #tpu.memory_space<vmem>>, vector<16x128xf32>,
    return
  }
}

</mosaic_0001>

<bundles_post_ra>
// kernel: tpu_custom_call.1
= control target key start
LH: loop header
LB: loop body
LE: loop exit
PB: predicated region body
PF: predicated region fallthrough
CT: control target
= control target key end

     0   :  { %11 = vsyncpa [#allocation3], 0  ;;  %s945_s0 = inlined_call_operand.vmem [shape: f32[16,32], index: 0, kind: input, shape index: {}]   ;;  %s946_s1 = inlined_call_operand.vmem [shape: f32[32,32], index: 1, kind: input, shape index: {}]   ;;  %s947_s2 = inlined_call_operand.hbm [shape: f32[32,32], index: 2, kind: input, shape index: {}]   ;;  %s948_s3 = inlined_call_operand.hbm [shape: f32[32,128], index: 3, kind: input, shape index: {}]   ;;  %s949_s4 = inlined_call_operand.vmem [shape: f32[32,16], index: 4, kind: input, shape index: {}]   ;;  %s950_s5 = inlined_call_operand.vmem [shape: f32[3,128], index: 5, kind: input, shape index: {}]   ;;  %s951_s6 = inlined_call_operand.hbm [shape: f32[16,128], index: 6, kind: output, shape index: {}]  }
   0x1   :  { %12 = vsyncpa [#allocation6], 0 }
   0x2   :  { %13 = vsyncpa [#allocation4], 0  ;;  %s824_s21 = smov [#allocation2]  }
   0x3   :  { %s23_s22 = sshll.u32 %s824_s21, 4  ;;  %s24_s22 = int_to_ptr.vmem [resolvable:$true] %s23_s22 }
   0x4   :  { %s766_s23 = scalar_lea.vmem %s24_s22, 512  ;;  %p771_p1 = scmp.lt.s32.totalorder %s24_s22, %s24_s22 }
   0x5   :  { %p767_p0 = scmp.ne.s32.totalorder %s24_s22, %s766_s23  ;;  %p772_p2 = scmp.lt.s32.totalorder %s766_s23, %s766_s23 }
   0x7   :  { %p773_p3 = por %p772_p2, %p771_p1 }
   0x9   :  { %p774_p4 = pnand %p773_p3, %p767_p0 }
   0xb   :  { %777 = shalt.err (!%p774_p4)
}
   0xc   :  { %s825_s24 = smov 128   ;;  %s826_s25 = smov 8  }
   0xd   :  { %29 = dma.hbm_to_vmem [thread:$0]  %s947_s2, 512, %s24_s22, [#allocation3], %s825_s24, %s825_s24, %s826_s25  }
   0xe   :  { %s827_s28 = smov [#allocation5]  }
   0xf   :  { %s35_s29 = sshll.u32 %s827_s28, 4  ;;  %s36_s29 = int_to_ptr.vmem [resolvable:$true] %s35_s29 }
  0x10   :  { %s786_s30 = scalar_lea.vmem %s36_s29, 512  ;;  %p791_p6 = scmp.lt.s32.totalorder %s36_s29, %s36_s29 }
  0x11   :  { %p787_p5 = scmp.ne.s32.totalorder %s36_s29, %s786_s30  ;;  %p792_p7 = scmp.lt.s32.totalorder %s786_s30, %s786_s30 }
  0x13   :  { %p793_p8 = por %p792_p7, %p791_p6 }
  0x15   :  { %p794_p9 = pnand %p793_p8, %p787_p5 }
  0x17   :  { %797 = shalt.err (!%p794_p9)
}
  0x18   :  { %41 = dma.hbm_to_vmem [thread:$0]  %s948_s3, 512, %s36_s29, [#allocation6], %s825_s24, %s825_s24, %s826_s25  }
  0x19   :  { %818 = dma.done.wait [#allocation3], 512  }
  0x1a   :  { %819 = vsyncadd [#allocation3], 4294966784 }
  0x1b   :  { %820 = dma.done.wait [#allocation6], 512  }
  0x1c   :  { %821 = vsyncadd [#allocation6], 4294966784  ;;  %vm63_vm0 = vcmask 261120   ;;  %v58_v0 = vld [vmem:[%s946_s1 + $0x18] sm:$0xff]  ;;  %v57_v1 = vld [vmem:[%s946_s1 + $0x10] sm:$0xff]  ;;  %vm149_vm1 = vcmask 130048   ;;  %v59_v8 = vlaneseq }
  0x1d   :  { %685 = vmatprep.subr.mxu0 %v58_v0  ;;  %v53_v2 = vld [vmem:[%s945_s0] sm:$0xff]  ;;  %v56_v3 = vld [vmem:[%s946_s1 + $0x8] sm:$0xff]  ;;  %v147_v7 = vld [vmem:[%s949_s4 + $0x10] sm:$0xff] }
  0x1e   :  { %686 = vmatpush3.msra.mxu0 %v58_v0  ;;  %693 = vmatprep.mubr.msk.f32.mxu0 %vm63_vm0, %v53_v2  ;;  %v55_v4 = vld [vmem:[%s946_s1] sm:$0xff]  ;;  %v54_v5 = vld [vmem:[%s945_s0 + $0x8] sm:$0xff]  ;;  %v907_v9 = vshrl.u32 %v59_v8, 7  ;;  %v254_v18 = vld [vmem:[#allocation2 + $0x18] sm:$0xff] }
  0x1f   :  { %687 = vmatprep.subr.mxu0 %v57_v1  ;;  %v899_v6 = vld [vmem:[%s949_s4] sm:$0xff]  ;;  %v146_v17 = vld [vmem:[%s949_s4 + $0x8] sm:$0xff]  ;;  %v148_v19 = vld [vmem:[%s949_s4 + $0x18] sm:$0xff]  ;;  %s828_s4 = smov [#allocation7]  }
  0x20   :  { %688 = vmatpush3.msra.mxu0 %v57_v1  ;;  %700 = vmatprep.mubr.msk.f32.mxu1 %vm149_vm1, %v899_v6  ;;  %v61_v10 = vsub.s32 0, %v907_v9  ;;  %v913_v11 = vld [vmem:[%s950_s5] sm:$0x7]  ;;  %v253_v20 = vld [vmem:[#allocation2 + $0x10] sm:$0xff]  ;;  %v252_v21 = vld [vmem:[#allocation2 + $0x8] sm:$0xff]  ;;  %v257_v31 = vsub.s32 1, %v907_v9 }
  0x21   :  { %689 = vmatprep.subr.mxu0 %v56_v3  ;;  %v251_v22 = vld [vmem:[#allocation2] sm:$0xff]  ;;  %v509_v41 = vld [vmem:[#allocation5 + $0x18] sm:$0xff]  ;;  %v508_v42 = vld [vmem:[#allocation5 + $0x10] sm:$0xff]  ;;  %v512_v51 = vsub.s32 2, %v907_v9  ;;  %s622_s28 = sshll.u32 %s828_s4, 4  ;;  %s623_s28 = int_to_ptr.vmem [resolvable:$true] %s622_s28 }
  0x22   :  { %690 = vmatpush3.msra.mxu0 %v56_v3  ;;  %v62_v12 = vrot.slane %v913_v11, %v61_v10  ;;  %v258_v34 = vrot.slane %v913_v11, %v257_v31  ;;  %v507_v43 = vld [vmem:[#allocation5 + $0x8] sm:$0xff]  ;;  %v506_v44 = vld [vmem:[#allocation5] sm:$0xff]  ;;  %s798_s29 = scalar_lea.vmem %s623_s28, 256  ;;  %p803_p11 = scmp.lt.s32.totalorder %s623_s28, %s623_s28 }
  0x23   :  { %691 = vmatprep.subr.mxu0 %v55_v4  ;;  %v513_v53 = vrot.slane %v913_v11, %v512_v51  ;;  %p799_p10 = scmp.ne.s32.totalorder %s623_s28, %s798_s29  ;;  %p804_p12 = scmp.lt.s32.totalorder %s798_s29, %s798_s29 }
  0x24   :  { %692 = vmatpush3.msra.mxu0 %v55_v4 }
  0x25   :  { %694 = vmatmul.mubr.msk.f32.vlgmr.msra.gmra.mxu0 %vm63_vm0, %v54_v5  ;;  %p805_p13 = por %p804_p12, %p803_p11 }
  0x26   :  { %724 = vmatprep.mubr.msk.f32.mxu0 %vm149_vm1, %v147_v7 }
  0x27   :  { %p806_p0 = pnand %p805_p13, %p799_p10 }
  0xe5   :  { %v695_v13 = vpop.f32.mrf.mxu0 }
  0xe6   :  { %v142_v14 = vadd.f32 %v695_v13, %v62_v12 }
  0xe7   :  { %v136_v15 = vpop.f32.mrf.mxu0 }
  0xe8   :  { %v137_v16 = vadd.f32 %v136_v15, %v62_v12  ;;  %696 = vmatprep.subr.mxu1 %v142_v14 }
  0xe9   :  { %697 = vmatpush3.msra.mxu1 %v142_v14 }
  0xea   :  { %698 = vmatprep.subr.mxu1 %v137_v16 }
  0xeb   :  { %699 = vmatpush3.msra.mxu1 %v137_v16 }
  0xec   :  { %701 = vmatmul.mubr.msk.f32.vlgmr.msra.gmra.mxu1 %vm149_vm1, %v146_v17  ;;  %706 = vmatprep.subr.mxu1 %v254_v18 }
  0xed   :  { %703 = vmatprep.mubr.msk.f32.mxu1 %vm149_vm1, %v147_v7  ;;  %707 = vmatpush3.msra.mxu1 %v254_v18 }
  0xee   :  { %708 = vmatprep.subr.mxu1 %v253_v20 }
  0xef   :  { %709 = vmatpush3.msra.mxu1 %v253_v20 }
  0xf0   :  { %704 = vmatmul.mubr.msk.f32.gmra.mxu1 %vm149_vm1, %v148_v19  ;;  %710 = vmatprep.subr.mxu1 %v252_v21 }
  0xf1   :  { %711 = vmatpush3.msra.mxu1 %v252_v21 }
  0xf2   :  { %712 = vmatprep.subr.mxu1 %v251_v22 }
  0xf3   :  { %713 = vmatpush3.msra.mxu1 %v251_v22 }
  0xf4   :  { %734 = vmatprep.subr.mxu1 %v509_v41 }
 0x1ac   :  { %v702_v23 = vpop.f32.mrf.mxu1 }
 0x1ad   :  { %v248_v26 = vmax.f32 %v702_v23, 0.0 }
 0x1ae   :  { %v228_v24 = vpop.f32.mrf.mxu1 }
 0x1af   :  { %v247_v25 = vmax.f32 %v228_v24, 0.0 }
 0x1b0   :  { %v705_v27 = vpop.f32.mrf.mxu1 }
 0x1b1   :  { %714 = vmatprep.mubr.msk.f32.mxu1 %vm63_vm0, %v247_v25  ;;  %v250_v30 = vmax.f32 %v705_v27, 0.0 }
 0x1b2   :  { %v238_v28 = vpop.f32.mrf.mxu1  ;;  %715 = vmatmul.mubr.msk.f32.vlgmr.msra.gmra.mxu1 %vm63_vm0, %v248_v26 }
 0x1b3   :  { %v249_v29 = vmax.f32 %v238_v28, 0.0  ;;  %735 = vmatpush3.msra.mxu1 %v509_v41 }
 0x1b4   :  { %736 = vmatprep.subr.mxu1 %v508_v42 }
 0x1b5   :  { %717 = vmatprep.mubr.msk.f32.mxu1 %vm63_vm0, %v249_v29  ;;  %737 = vmatpush3.msra.mxu1 %v508_v42 }
 0x1b6   :  { %718 = vmatmul.mubr.msk.f32.gmra.mxu1 %vm63_vm0, %v250_v30  ;;  %738 = vmatprep.subr.mxu1 %v507_v43 }
 0x1b7   :  { %739 = vmatpush3.msra.mxu1 %v507_v43 }
 0x1b8   :  { %740 = vmatprep.subr.mxu1 %v506_v44 }
 0x1b9   :  { %741 = vmatpush3.msra.mxu1 %v506_v44 }
 0x272   :  { %v716_v32 = vpop.f32.mrf.mxu1 }
 0x273   :  { %v343_v39 = vadd.f32 %v716_v32, %v258_v34 }
 0x274   :  { %v337_v33 = vpop.f32.mrf.mxu1 }
 0x275   :  { %v338_v40 = vadd.f32 %v337_v33, %v258_v34 }
 0x276   :  { %v719_v35 = vpop.f32.mrf.mxu1 }
 0x277   :  { %v353_v36 = vadd.f32 %v719_v35, %v258_v34 }
 0x278   :  { %v347_v37 = vpop.f32.mrf.mxu1 }
 0x279   :  { %v348_v38 = vadd.f32 %v347_v37, %v258_v34  ;;  %720 = vmatprep.subr.mxu0 %v353_v36 }
 0x27a   :  { %721 = vmatpush3.msra.mxu0 %v353_v36 }
 0x27b   :  { %722 = vmatprep.subr.mxu0 %v348_v38 }
 0x27c   :  { %723 = vmatpush3.msra.mxu0 %v348_v38 }
 0x27d   :  { %725 = vmatmul.mubr.msk.f32.vlgmr.msra.gmra.mxu0 %vm149_vm1, %v148_v19  ;;  %727 = vmatprep.subr.mxu0 %v343_v39 }
 0x27e   :  { %728 = vmatpush3.msra.mxu0 %v343_v39  ;;  %731 = vmatprep.mubr.msk.f32.mxu0 %vm149_vm1, %v899_v6 }
 0x27f   :  { %729 = vmatprep.subr.mxu0 %v338_v40 }
 0x280   :  { %730 = vmatpush3.msra.mxu0 %v338_v40 }
 0x281   :  { %732 = vmatmul.mubr.msk.f32.vlgmr.msra.gmra.mxu0 %vm149_vm1, %v146_v17 }
 0x33d   :  { %v726_v45 = vpop.f32.mrf.mxu0 }
 0x33f   :  { %v422_v46 = vpop.f32.mrf.mxu0 }
 0x341   :  { %v733_v47 = vpop.f32.mrf.mxu0 }
 0x342   :  { %v503_v50 = vadd.f32 %v733_v47, %v726_v45 }
 0x343   :  { %v497_v48 = vpop.f32.mrf.mxu0 }
 0x344   :  { %v498_v49 = vadd.f32 %v497_v48, %v422_v46 }
 0x346   :  { %742 = vmatprep.mubr.msk.f32.mxu1 %vm63_vm0, %v498_v49 }
 0x347   :  { %743 = vmatmul.mubr.msk.f32.vlgmr.msra.gmra.mxu1 %vm63_vm0, %v503_v50 }
 0x407   :  { %v744_v52 = vpop.f32.mrf.mxu1 }
 0x408   :  { %v592_v56 = vadd.f32 %v744_v52, %v513_v53 }
 0x409   :  { %v586_v54 = vpop.f32.mrf.mxu1 }
 0x40a   :  { %v587_v55 = vadd.f32 %v586_v54, %v513_v53 }
 0x40c   :  { %595 = vmax.xlane.f32.xlu0 %v587_v55 }
 0x410   :  { %597 = vmax.xlane.f32.xlu0 %v592_v56 }
 0x495   :  { %v596_v57 = vpop.xlane.xlu0 %595 }
 0x496   :  { %v599_v58 = vsub.f32 %v587_v55, %v596_v57 }
 0x498   :  { %v601_v59 = vmul.f32 1.442695, %v599_v58 }
 0x499   :  { %v598_v60 = vpop.xlane.xlu0 %597 }
 0x49a   :  { %v600_v61 = vsub.f32 %v592_v56, %v598_v60  ;;  %750 = vpow2.f32 %v601_v59 }
 0x49c   :  { %v603_v62 = vmul.f32 1.442695, %v600_v61 }
 0x49e   :  { %752 = vpow2.f32 %v603_v62 }
 0x4a7   :  { %v751_v63 = vpop.eup %750 }
 0x4a8   :  { %605 = vadd.xlane.f32.xlu1 %v751_v63 }
 0x4ab   :  { %v753_v0 = vpop.eup %752 }
 0x4ac   :  { %607 = vadd.xlane.f32.xlu1 %v753_v0 }
 0x531   :  { %v606_v1 = vpop.xlane.xlu1 %605 }
 0x532   :  { %754 = vlog2.f32 %v606_v1 }
 0x535   :  { %v608_v2 = vpop.xlane.xlu1 %607 }
 0x536   :  { %756 = vlog2.f32 %v608_v2 }
 0x53f   :  { %v755_v3 = vpop.eup %754 }
 0x540   :  { %v610_v4 = vmul.f32 0.6931472, %v755_v3 }
 0x542   :  { %v613_v5 = vsub.f32 %v599_v58, %v610_v4 }
 0x543   :  { %v757_v6 = vpop.eup %756 }
 0x544   :  { %v612_v7 = vmul.f32 0.6931472, %v757_v6  ;;  %615 = vst [vmem:[#allocation7] sm:$0xff] %v613_v5 }
 0x546   :  { %v614_v8 = vsub.f32 %v600_v61, %v612_v7 }
 0x548   :  { %616 = vst [vmem:[#allocation7 + $0x8] sm:$0xff] %v614_v8 }
 0x549   :  { %809 = shalt.err (!%p806_p0)
}
 0x54a   :  { %628 = dma.vmem_to_hbm [thread:$0]  %s623_s28, 256, %s951_s6, [#allocation4], %s825_s24, %s825_s24, %s826_s25  }
 0x54b   :  { %822 = dma.done.wait [#allocation4], 256  }
 0x54c   :  { %823 = vsyncadd [#allocation4], 4294967040 }
 0x54d   :  { %632 = vsyncpa [#allocation3], 1 }
 0x54e   :  { %633 = vsyncpa [#allocation6], 1 }
 0x54f   :  { %634 = vsyncpa [#allocation4], 1 }

</bundles_post_ra>
